<compile_context>
chip_gen: v7x
topology: tpu7x:2x2x1
jax: 0.10.0
libtpu: 0.0.40
codegen_flags: <defaults>
</compile_context>

<pallas_src>
import functools

import jax
import jax.numpy as jnp
from jax.experimental import pallas as pl
from jax.experimental.pallas import tpu as pltpu

EPS = 1e-5  # nn.InstanceNorm2d default eps


def _round_up(x, m):
    return (x + m - 1) // m * m


# ----------------------------- Pallas kernel --------------------------------
def _convblock_kernel(w_ref, p_ref, o_ref):
    # w_ref: (Coutp, Kp) bf16 | p_ref: (1, Kp, HW) bf16 | o_ref: (1, Coutp, HW) f32
    # Convolution as a single MXU matmul, f32 accumulation.
    y = jnp.dot(w_ref[...], p_ref[0], preferred_element_type=jnp.float32)  # (Coutp, HW)
    # InstanceNorm2d (no affine, biased variance) over the spatial (lane) axis.
    mean = jnp.mean(y, axis=1, keepdims=True)            # (Coutp, 1)
    yc = y - mean                                        # centered once, reused twice
    var = jnp.mean(yc * yc, axis=1, keepdims=True)
    inv = jax.lax.rsqrt(var + EPS)                       # EUP slot
    # ReLU + lane-dense store (HW = multiple of 128 -> unmasked vst).
    o_ref[0] = jnp.maximum(yc * inv, 0.0)


# ------------------------------ glue / wrapper -------------------------------
def _im2col(xp, kh, kw, stride):
    # xp: (N, C, Hp, Wp) already padded -> (N, C*kh*kw, Ho*Wo)  (no transpose)
    N, C, Hp, Wp = xp.shape
    Ho = (Hp - kh) // stride + 1
    Wo = (Wp - kw) // stride + 1
    cols = []
    for i in range(kh):
        for j in range(kw):
            cols.append(xp[:, :, i:i + Ho * stride:stride, j:j + Wo * stride:stride])
    p = jnp.stack(cols, axis=2)                 # (N, C, kh*kw, Ho, Wo)
    p = p.reshape(N, C * kh * kw, Ho * Wo)      # K ordering matches PyTorch weight flatten
    return p, Ho, Wo


def conv_block_forward(x, weight, bias=None, *, stride=1, padding=1,
                       compute_dtype=jnp.bfloat16):
    """ConvBlock forward: reflect-pad Conv2d -> InstanceNorm2d -> ReLU.

    x: (N, Cin, H, W) f32; weight: (Cout, Cin, kh, kw); bias: (Cout,) or None.
    The conv bias is intentionally not applied inside the kernel: InstanceNorm2d
    (affine=False) subtracts the per-channel spatial mean, which cancels any
    per-channel constant exactly, so the bias is pure dead work.
    """
    del bias  # exactly cancelled by InstanceNorm's mean subtraction
    N, Cin, H, W = x.shape
    Cout, _, kh, kw = weight.shape

    # Reflect padding (padding_mode='reflect'), plain JAX glue.
    xp = jnp.pad(x, ((0, 0), (0, 0), (padding, padding), (padding, padding)),
                 mode="reflect")

    # im2col straight into the lane-dense (N, K, HW) layout, in the (bf16)
    # compute dtype, which halves the HBM bytes fed to the kernel.
    # TODO(synk): at production H*W / Cin, move patch expansion inside the kernel
    # (kh*kw shifted matmuls from the padded input, ~9x less input HBM traffic)
    # and add a second "arbitrary" grid axis tiling HW with accumulated
    # sum/sum-sq statistics + pl.when finalize so the per-step working set fits
    # v7x's 64 MiB VMEM; unnecessary at these small test shapes.
    patches, Ho, Wo = _im2col(xp.astype(compute_dtype), kh, kw, stride)  # (N, K, HW)
    HW = Ho * Wo
    K = Cin * kh * kw

    # Zero-pad K (contraction) to a multiple of 16 and Cout to a multiple of 8
    # so MXU / sublane tiles are clean; zero padding is numerically exact.
    Kp = _round_up(K, 16)
    Coutp = _round_up(Cout, 8)
    patches = jnp.pad(patches, ((0, 0), (0, Kp - K), (0, 0)))
    w_mat = jnp.pad(weight.reshape(Cout, K).astype(compute_dtype),
                    ((0, Coutp - Cout), (0, Kp - K)))                 # (Coutp, Kp)

    out = pl.pallas_call(
        _convblock_kernel,
        out_shape=jax.ShapeDtypeStruct((N, Coutp, HW), jnp.float32),
        grid_spec=pltpu.PrefetchScalarGridSpec(
            num_scalar_prefetch=0,
            grid=(N,),                                             # one image / step
            in_specs=[
                pl.BlockSpec((Coutp, Kp), lambda n: (0, 0)),       # weight (resident)
                pl.BlockSpec((1, Kp, HW), lambda n: (n, 0, 0)),    # patches
            ],
            out_specs=pl.BlockSpec((1, Coutp, HW), lambda n: (n, 0, 0)),
        ),
        compiler_params=pltpu.CompilerParams(
            # batch axis is independent; N >= 2 gives both v7x TCs work
            dimension_semantics=("parallel",)),
    )(w_mat, patches)

    # Lane-dense kernel output reshapes straight to NCHW — no transpose needed.
    return out[:, :Cout, :].reshape(N, Cout, Ho, Wo)


# ------------------------------ reference (JAX) ------------------------------
def _reference(x, weight, bias, *, stride=1, padding=1, conv_dtype=jnp.float32):
    # Bias IS applied here (as in nn.Conv2d) to demonstrate that dropping it in
    # the kernel is exact: InstanceNorm cancels it.
    xp = jnp.pad(x, ((0, 0), (0, 0), (padding, padding), (padding, padding)),
                 mode="reflect")
    y = jax.lax.conv_general_dilated(
        xp.astype(conv_dtype), weight.astype(conv_dtype),
        window_strides=(stride, stride), padding="VALID",
        dimension_numbers=("NCHW", "OIHW", "NCHW"),
        preferred_element_type=jnp.float32)
    y = y + bias.reshape(1, -1, 1, 1).astype(jnp.float32)
    mean = jnp.mean(y, axis=(2, 3), keepdims=True)
    var = jnp.mean((y - mean) ** 2, axis=(2, 3), keepdims=True)
    y = (y - mean) / jnp.sqrt(var + EPS)
    return jnp.maximum(y, 0.0)


# ---------------------------------- main -------------------------------------
if __name__ == "__main__":
    key = jax.random.PRNGKey(0)
    k_x, k_w, k_b = jax.random.split(key, 3)

    # ConvBlock(in_ch=4, out_ch=8, is_down=True, use_identity=True,
    #           kernel_size=3, stride=1, padding=1)
    N, Cin, H, W = 2, 4, 16, 16
    Cout, kh, kw = 8, 3, 3

    x = jax.random.normal(k_x, (N, Cin, H, W), dtype=jnp.float32)
    weight = jax.random.normal(k_w, (Cout, Cin, kh, kw), dtype=jnp.float32) * 0.1
    bias = jax.random.normal(k_b, (Cout,), dtype=jnp.float32) * 0.1

    fwd = jax.jit(functools.partial(conv_block_forward, stride=1, padding=1))
    out = jax.block_until_ready(fwd(x, weight, bias))
    assert out.shape == (N, Cout, H, W)

    # Tight check vs a reference that uses the same bf16-rounded matmul inputs
    # (validates kernel layout / norm / relu logic exactly, modulo f32 sum order).
    ref_q = jax.block_until_ready(
        _reference(x, weight, bias, stride=1, padding=1, conv_dtype=jnp.bfloat16))
    assert jnp.allclose(out, ref_q, atol=1e-3, rtol=1e-3), "mismatch vs bf16 reference"

    # Sanity check vs the full-f32 reference (bf16 input quantization only).
    ref_f32 = jax.block_until_ready(
        _reference(x, weight, bias, stride=1, padding=1, conv_dtype=jnp.float32))
    assert jnp.allclose(out, ref_f32, atol=5e-2, rtol=5e-2), "mismatch vs f32 reference"

    print("KERNEL_OK")
</pallas_src>

<mosaic_0001>
module attributes {stable_mosaic.version = 11 : i64} {
  func.func @_convblock_kernel(%arg0: i32, %arg1: memref<8x48xbf16, #tpu.memory_space<vmem>>, %arg2: memref<1x48x256xbf16, #tpu.memory_space<vmem>>, %arg3: memref<1x8x256xf32, #tpu.memory_space<vmem>>) attributes {dimension_semantics = [#tpu.dimension_semantics<parallel>], iteration_bounds = array<i64: 2>, scalar_prefetch = 0 : i64, scratch_operands = 0 : i64, tpu.core_type = #tpu.core_type<tc>, window_params = [{pipeline_mode = #tpu.pipeline_mode<synchronous>, transform_indices = @transform_0, window_bounds = array<i64: 8, 48>}, {transform_indices = @transform_1, window_bounds = array<i64: 1, 48, 256>}, {transform_indices = @transform_2, window_bounds = array<i64: 1, 8, 256>}]} {
    %c0 = arith.constant 0 : index
    %c0_0 = arith.constant 0 : index
    %0 = vector.load %arg1[%c0, %c0_0] : memref<8x48xbf16, #tpu.memory_space<vmem>>, vector<8x48xbf16>
    %c0_1 = arith.constant 0 : index
    %c0_2 = arith.constant 0 : index
    %c0_3 = arith.constant 0 : index
    %1 = vector.load %arg2[%c0_1, %c0_2, %c0_3] : memref<1x48x256xbf16, #tpu.memory_space<vmem>>, vector<1x48x256xbf16>
    %2 = vector.shape_cast %1 : vector<1x48x256xbf16> to vector<48x256xbf16>
    %cst = arith.constant dense<0.000000e+00> : vector<8x256xf32>
    %3 = tpu.matmul %0, %2, %cst {dimension_numbers = #tpu.dot_dimension_numbers<[1], [0], [0], [1], [0, 0, 1, 1], [], []>} : vector<8x48xbf16>, vector<48x256xbf16>, vector<8x256xf32> -> vector<8x256xf32>
    %cst_4 = arith.constant dense<0.000000e+00> : vector<8xf32>
    %4 = vector.multi_reduction <add>, %3, %cst_4 [1] : vector<8x256xf32> to vector<8xf32>
    %5 = vector.shape_cast %4 : vector<8xf32> to vector<8x1xf32>
    %cst_5 = arith.constant 2.560000e+02 : f32
    %6 = vector.broadcast %cst_5 : f32 to vector<8x1xf32>
    %7 = arith.divf %5, %6 : vector<8x1xf32>
    %8 = vector.broadcast %7 : vector<8x1xf32> to vector<8x256xf32>
    %9 = arith.subf %3, %8 : vector<8x256xf32>
    %10 = arith.mulf %9, %9 : vector<8x256xf32>
    %cst_6 = arith.constant dense<0.000000e+00> : vector<8xf32>
    %11 = vector.multi_reduction <add>, %10, %cst_6 [1] : vector<8x256xf32> to vector<8xf32>
    %12 = vector.shape_cast %11 : vector<8xf32> to vector<8x1xf32>
    %cst_7 = arith.constant 2.560000e+02 : f32
    %13 = vector.broadcast %cst_7 : f32 to vector<8x1xf32>
    %14 = arith.divf %12, %13 : vector<8x1xf32>
    %cst_8 = arith.constant 9.99999974E-6 : f32
    %15 = vector.broadcast %cst_8 : f32 to vector<8x1xf32>
    %16 = arith.addf %14, %15 : vector<8x1xf32>
    %17 = math.rsqrt %16 : vector<8x1xf32>
    %18 = vector.broadcast %17 : vector<8x1xf32> to vector<8x256xf32>
    %19 = arith.mulf %9, %18 : vector<8x256xf32>
    %cst_9 = arith.constant 0.000000e+00 : f32
    %20 = vector.broadcast %cst_9 : f32 to vector<8x256xf32>
    %21 = arith.maximumf %19, %20 : vector<8x256xf32>
    %c0_10 = arith.constant 0 : index
    %c0_11 = arith.constant 0 : index
    %c0_12 = arith.constant 0 : index
    %22 = vector.load %arg3[%c0_10, %c0_11, %c0_12] : memref<1x8x256xf32, #tpu.memory_space<vmem>>, vector<1x8x256xf32>
    %23 = vector.shape_cast %22 : vector<1x8x256xf32> to vector<8x256xf32>
    %24 = vector.shape_cast %21 : vector<8x256xf32> to vector<1x8x256xf32>
    tpu.vector_store %arg3[%c0_10, %c0_11, %c0_12], %24 {strides = array<i32>} : memref<1x8x256xf32, #tpu.memory_space<vmem>>, vector<1x8x256xf32>,
    return
  }
  func.func @transform_0(%arg0: i32) -> (i32, i32) {
    %c0_i32 = arith.constant 0 : i32
    %c0_i32_0 = arith.constant 0 : i32
    %c0_i32_1 = arith.constant 0 : i32
    return %c0_i32, %c0_i32_0 : i32, i32
  }
  func.func @transform_1(%arg0: i32) -> (i32, i32, i32) {
    %c0_i32 = arith.constant 0 : i32
    %c0_i32_0 = arith.constant 0 : i32
    %c0_i32_1 = arith.constant 0 : i32
    return %arg0, %c0_i32, %c0_i32_0 : i32, i32, i32
  }
  func.func @transform_2(%arg0: i32) -> (i32, i32, i32) {
    %c0_i32 = arith.constant 0 : i32
    %c0_i32_0 = arith.constant 0 : i32
    %c0_i32_1 = arith.constant 0 : i32
    return %arg0, %c0_i32, %c0_i32_0 : i32, i32, i32
  }
}

</mosaic_0001>

<bundles_post_ra>
// kernel: conv_block_forward.1
= control target key start
LH: loop header
LB: loop body
LE: loop exit
PB: predicated region body
PF: predicated region fallthrough
CT: control target
= control target key end

     0   :  { %s366_s9 = smov 0   ;;  %s390_s0 = inlined_call_operand.vmem [shape: bf16[8,48], index: 0, kind: input, shape index: {}]   ;;  %s391_s1 = inlined_call_operand.vmem [shape: bf16[2,48,256], index: 1, kind: input, shape index: {}]   ;;  %s392_s2 = inlined_call_operand.vmem [shape: f32[2,8,256], index: 2, kind: output, shape index: {}]  }
   0x1 LB: > { %s303_s10 = sadd.s32 4294967295, %s348_s9   ;;  %p307_p0 = scmp.ge.s32.totalorder %s348_s9, 1  ;;  %s348_s9 = sphi %s366_s9, %s12_s9  }
   0x2   : > { %p112_p1 = scmp.lt.s32.totalorder %s348_s9, 3 }
   0x4   : > { %p113_p2 = pnand %p307_p0, %p112_p1 }
   0x5   : > { %p134_p3 = scmp.lt.s32.totalorder (!%p113_p2), %s303_s10, 1  ;;  %v350_v0 = vmov (!%p113_p2), 0   ;;  %v145_v7 = vld [vmem:[%s390_s0] sm:$0xf] (!%p113_p2)  ;;  %vm182_vm0 = vcmask (!%p113_p2), 392192  }
   0x6   : > { %116 = sbr.rel (%p113_p2) target bundleno = 557 (0x22d), region = 28  ;;  %218 = vmatprep.mubr.bf16.mxu0 (!%p113_p2), %v350_v0 }
   0xd   : > { %s394_s10 = smov (!%p134_p3, %s303_s10), 1 }
   0xe   : > { %s321_s11 = smul.u32 48, %s394_s10  ;;  %s320_s17 = sshll.u32 %s394_s10, 4 }
   0xf   : > { %s143_s20 = scalar_lea.vmem %s392_s2, %s320_s17 }
  0x10   : > { %s138_s14 = scalar_lea.vmem %s391_s1, %s321_s11 }
  0x11   : > { %v331_v1 = vld [vmem:[%s138_s14 + $0x4] ss:$8 sps:$4 sm:$0xff]   ;;  %v333_v2 = vld [vmem:[%s138_s14] ss:$8 sps:$4 sm:$0xff]   ;;  %v334_v3 = vld [vmem:[%s138_s14 + $0x14] ss:$8 sps:$4 sm:$0xff]  }
  0x12   : > { %186 = vmatprep.subr.bf16.mxu0 %v331_v1  ;;  %v336_v4 = vld [vmem:[%s138_s14 + $0x10] ss:$8 sps:$4 sm:$0xff]   ;;  %v337_v5 = vld [vmem:[%s138_s14 + $0x24] ss:$8 sps:$4 sm:$0xff]   ;;  %v339_v6 = vld [vmem:[%s138_s14 + $0x20] ss:$8 sps:$4 sm:$0xff]  }
  0x13   : > { %187 = vmatpush1.bf16.msra.mxu0 %v333_v2 }
  0x14   : > { %188 = vmatprep.subr.bf16.mxu0 %v334_v3 }
  0x17   : > { %189 = vmatpush1.bf16.msra.mxu0 %v336_v4 }
  0x18   : > { %190 = vmatprep.subr.bf16.mxu0 %v337_v5 }
  0x1b   : > { %191 = vmatpush1.bf16.msra.mxu0 %v339_v6 }
  0x1e   : > { %317 = vmatmul.mubr.msk.bf16.vlgmr.msra.gmra.mrb[0].mxu0 %vm182_vm0, %v145_v7 }
  0xf1   : > { %v220_v8 = vpop.f32.mrb[0].mxu0 }
  0xf2   : > { %v222_v9 = vpop.f32.mrb[1].mxu0 }
  0xf3   : > { %v224_v10 = vpop.f32.mrb[2].mxu0  ;;  %v227_v11 = vadd.f32 %v222_v9, %v220_v8 }
  0xf4   : > { %v225_v12 = vpop.f32.mrb[3].mxu0 }
  0xf5   : > { %228 = vadd.xlane.f32.xlu0 %v227_v11 }
 0x182   : > { %v229_v13 = vpop.xlane.xlu0 %228 }
 0x183   : > { %v231_v14 = vmul.f32 0.00390625, %v229_v13 }
 0x185   : > { %v232_v15 = vsub.f32 %v220_v8, %v231_v14  ;;  %v233_v16 = vsub.f32 %v222_v9, %v231_v14 }
 0x187   : > { %v234_v17 = vmul.f32 %v232_v15, %v232_v15  ;;  %v235_v18 = vmul.f32 %v233_v16, %v233_v16 }
 0x189   : > { %v236_v19 = vadd.f32 %v235_v18, %v234_v17 }
 0x18b   : > { %237 = vadd.xlane.f32.xlu0 %v236_v19 }
 0x218   : > { %v238_v20 = vpop.xlane.xlu0 %237 }
 0x219   : > { %v239_v21 = vmul.f32 0.00390625, %v238_v20 }
 0x21b   : > { %v240_v22 = vadd.f32 1e-05, %v239_v21 }
 0x21d   : > { %340 = vrsqrt.f32 %v240_v22 }
 0x227   : > { %v341_v23 = vpop.eup %340 }
 0x228   : > { %v242_v24 = vmul.f32 %v341_v23, %v232_v15  ;;  %v243_v25 = vmul.f32 %v341_v23, %v233_v16 }
 0x22a   : > { %v244_v26 = vmax.f32 %v242_v24, 0.0  ;;  %v245_v27 = vmax.f32 %v243_v25, 0.0 }
 0x22c   : > { %246 = vst [vmem:[%s143_s20] sm:$0xff] %v244_v26  ;;  %247 = vst [vmem:[%s143_s20 + $0x8] sm:$0xff] %v245_v27 }
 0x22d PF: > { %s12_s9 = sadd.s32 1, %s348_s9  }
 0x22e   : > { %p9_p4 = scmp.ge.s32.totalorder %s12_s9, 4  }
 0x230   :  { %11 = sbr.rel (!%p9_p4) target bundleno = 1 (0x1), region = 58 }

</bundles_post_ra>
